<compile_context>
chip_gen: v7x
topology: tpu7x:2x2x1
jax: 0.10.0
libtpu: 0.0.40
codegen_flags: <defaults>
</compile_context>

<pallas_src>
import numpy as np
import jax
import jax.numpy as jnp
from jax.experimental import pallas as pl
from jax.experimental.pallas import tpu as pltpu


def _round_up(v: int, m: int) -> int:
    return (v + m - 1) // m * m


def _make_scn_kernel(tm: int, tk: int, n_pad: int, f_pad: int):
    """Fused Chebyshev recursion + linear projection kernel body."""

    def kernel(L_ref, x_ref, w_ref, b_ref, o_ref, acc_ref, t_ref):
        s = pl.program_id(0)            # Chebyshev step: computes T_{s+1}
        r = pl.program_id(1)            # row tile of L / of the output
        c = pl.program_id(2)            # column tile of L (contraction axis)
        last_c = pl.num_programs(2) - 1

        row0 = pl.multiple_of(r * tm, tm)
        col0 = pl.multiple_of(c * tk, tk)
        cur = s % 2                     # t_ref buffer holding T_s (= T_{j-1})
        nxt = 1 - cur                   # buffer holding T_{s-1}; receives T_{s+1}

        # One-time init: buffer 1 plays the role of "T_{-1}" = 0 at step 0.
        @pl.when((s == 0) & (r == 0) & (c == 0))
        def _zero_t_minus1():
            t_ref[n_pad:, :] = jnp.zeros((n_pad, f_pad), jnp.float32)

        # Stage T_0 = x into buffer 0, streamed in column-tile chunks.  Only
        # needed while the first row tile of the first step walks the columns.
        @pl.when((s == 0) & (r == 0))
        def _stage_x():
            t_ref[pl.ds(col0, tk), :] = x_ref[...]

        # acc[r] += L[row tile, col tile] @ T_{j-1}[col tile]
        @pl.when(c == 0)
        def _zero_acc():
            acc_ref[...] = jnp.zeros_like(acc_ref)

        src = pl.multiple_of(cur * n_pad + col0, 128)
        acc_ref[...] += jnp.dot(L_ref[...], t_ref[pl.ds(src, tk), :],
                                preferred_element_type=jnp.float32)

        # Last column tile: finish T_{s+1}, project, accumulate the output.
        @pl.when(c == last_c)
        def _finish():
            dst = pl.multiple_of(nxt * n_pad + row0, 128)
            t_prev2 = t_ref[pl.ds(dst, tm), :]            # T_{s-1}[r] (0 at s==0)
            alpha = jnp.where(s == 0, jnp.float32(1.0), jnp.float32(2.0))
            t_new = alpha * acc_ref[...] - t_prev2        # T_{s+1}[r]
            t_ref[pl.ds(dst, tm), :] = t_new

            proj = jnp.dot(t_new, w_ref[s + 1],
                           preferred_element_type=jnp.float32)

            @pl.when(s == 0)
            def _first_write():                           # bias + T_0 W_0 + T_1 W_1
                t0 = t_ref[pl.ds(row0, tm), :]            # buffer 0 holds T_0 = x
                o_ref[pl.ds(row0, tm), :] = (
                    b_ref[...]
                    + jnp.dot(t0, w_ref[0], preferred_element_type=jnp.float32)
                    + proj)

            @pl.when(s > 0)
            def _accumulate():                            # += T_{s+1} W_{s+1}
                o_ref[pl.ds(row0, tm), :] = o_ref[pl.ds(row0, tm), :] + proj

    return kernel


def scn_layer_forward(L, x, weight, bias, k: int):
    """Pallas implementation of SCNLayer.forward(L, x).

    L: (N, N), x: (N, F), weight: (O, k*F) (PyTorch nn.Linear layout),
    bias: (O,) or None.  Returns (N, O) in x.dtype.
    """
    N, F = x.shape
    O = weight.shape[0]
    assert k >= 1, "SCNLayer requires k >= 1"
    assert L.shape == (N, N)
    assert weight.shape == (O, k * F)

    f_pad = _round_up(F, 128)
    o_pad = _round_up(O, 128)

    # Tile selection: small problems keep L resident as one block; larger ones
    # stream L through (256, 512) f32 tiles (0.5 MiB each, double buffered).
    n_pad128 = _round_up(N, 128)
    if n_pad128 <= 1024:
        n_pad = n_pad128
        tm = tk = n_pad
    else:
        tm, tk = 256, 512
        n_pad = _round_up(N, 512)

    n_steps = max(k - 1, 1)    # k == 1 still runs one step, projected with W_1 = 0.

    f32 = jnp.float32
    Lp = jnp.zeros((n_pad, n_pad), f32).at[:N, :N].set(jnp.asarray(L, f32))
    xp = jnp.zeros((n_pad, f_pad), f32).at[:N, :F].set(jnp.asarray(x, f32))

    w_t = jnp.asarray(weight, f32).T.reshape(k, F, O)        # per-term W_j^T
    wp = jnp.zeros((n_steps + 1, f_pad, o_pad), f32).at[:k, :F, :O].set(w_t)

    if bias is None:
        bp = jnp.zeros((1, o_pad), f32)
    else:
        bp = jnp.zeros((1, o_pad), f32).at[0, :O].set(jnp.asarray(bias, f32))

    grid = (n_steps, n_pad // tm, n_pad // tk)

    def x_index_map(s, r, c):
        # x is only consumed while (s == 0, r == 0) stages T_0; pin the block
        # index to 0 otherwise so the pipeline does not re-fetch x every step.
        first = 1 - jnp.minimum(s + r, 1)        # 1 iff (s == 0 and r == 0)
        return (c * first, 0)

    vmem_bytes = 4 * (
        2 * tm * tk                              # L tiles (double buffered)
        + 2 * tk * f_pad                         # x tiles
        + 2 * (n_steps + 1) * f_pad * o_pad      # W^T (resident)
        + 2 * o_pad                              # bias
        + 2 * n_pad * o_pad                      # resident output accumulator
        + tm * f_pad                             # contraction accumulator scratch
        + 2 * n_pad * f_pad                      # Chebyshev ping-pong buffers
    )
    vmem_limit = min(128 << 20, max(32 << 20, vmem_bytes * 3 // 2 + (2 << 20)))

    kernel = _make_scn_kernel(tm, tk, n_pad, f_pad)
    out = pl.pallas_call(
        kernel,
        out_shape=jax.ShapeDtypeStruct((n_pad, o_pad), f32),
        grid_spec=pltpu.PrefetchScalarGridSpec(
            num_scalar_prefetch=0,
            grid=grid,
            in_specs=[
                pl.BlockSpec((tm, tk), lambda s, r, c: (r, c)),              # L
                pl.BlockSpec((tk, f_pad), x_index_map),                      # x
                pl.BlockSpec((n_steps + 1, f_pad, o_pad),
                             lambda s, r, c: (0, 0, 0)),                     # W^T
                pl.BlockSpec((1, o_pad), lambda s, r, c: (0, 0)),            # bias
            ],
            out_specs=pl.BlockSpec((n_pad, o_pad), lambda s, r, c: (0, 0)),
            scratch_shapes=[
                pltpu.VMEM((tm, f_pad), f32),          # L[r,:] @ T_{j-1} accumulator
                pltpu.VMEM((2 * n_pad, f_pad), f32),   # T_{j-1}/T_{j-2} ping-pong
            ],
        ),
        compiler_params=pltpu.CompilerParams(
            # Every row tile of step j reads ALL rows of T_{j-1}; no grid axis
            # can be safely sharded across TensorCores without cross-core
            # exchange of the T buffers, so all axes stay sequential.
            dimension_semantics=("arbitrary", "arbitrary", "arbitrary"),
            vmem_limit_bytes=int(vmem_limit),
        ),
    )(Lp, xp, wp, bp)
    return out[:N, :O].astype(x.dtype)


def scn_layer_reference(L, x, weight, bias, k: int):
    """Pure-JAX reference matching the PyTorch module semantics."""
    terms = [x]
    if k > 1:
        terms.append(L @ x)
    for _ in range(2, k):
        terms.append(2.0 * (L @ terms[-1]) - terms[-2])
    X = jnp.concatenate(terms, axis=1)               # (N, k*F)
    out = X @ weight.T
    if bias is not None:
        out = out + bias
    return out


if __name__ == "__main__":
    def run_case(seed, N, F, O, k, normalize, rtol, atol):
        key = jax.random.PRNGKey(seed)
        k_l, k_x, k_w, k_b = jax.random.split(key, 4)

        # Symmetric "Laplacian-like" operator.
        A = jax.random.normal(k_l, (N, N), dtype=jnp.float32)
        L = 0.5 * (A + A.T)
        if normalize:
            L = L / jnp.sqrt(jnp.float32(N))

        x = jax.random.normal(k_x, (N, F), dtype=jnp.float32)

        # nn.Linear(k*F, O) default init: U(-1/sqrt(in), 1/sqrt(in)).
        in_features = k * F
        bound = 1.0 / np.sqrt(in_features)
        weight = jax.random.uniform(k_w, (O, in_features), dtype=jnp.float32,
                                    minval=-bound, maxval=bound)
        bias = jax.random.uniform(k_b, (O,), dtype=jnp.float32,
                                  minval=-bound, maxval=bound)

        out = jax.block_until_ready(scn_layer_forward(L, x, weight, bias, k))
        ref = scn_layer_reference(L, x, weight, bias, k)
        np.testing.assert_allclose(np.asarray(out), np.asarray(ref),
                                   rtol=rtol, atol=atol)

    # Small case (single resident L block), module-default-like shapes.
    run_case(seed=0, N=16, F=8, O=32, k=3, normalize=False,
             rtol=1e-5, atol=2e-5)
    # Moderate case exercising the streaming path: multi row/col tiles, k=4.
    run_case(seed=1, N=1100, F=12, O=40, k=4, normalize=True,
             rtol=2e-4, atol=2e-4)

    print("KERNEL_OK")
</pallas_src>

<mosaic_0001>
module attributes {stable_mosaic.version = 11 : i64} {
  func.func @kernel(%arg0: i32, %arg1: i32, %arg2: i32, %arg3: memref<128x128xf32, #tpu.memory_space<vmem>>, %arg4: memref<128x128xf32, #tpu.memory_space<vmem>>, %arg5: memref<3x128x128xf32, #tpu.memory_space<vmem>>, %arg6: memref<1x128xf32, #tpu.memory_space<vmem>>, %arg7: memref<128x128xf32, #tpu.memory_space<vmem>>, %arg8: memref<128x128xf32, #tpu.memory_space<vmem>>, %arg9: memref<256x128xf32, #tpu.memory_space<vmem>>) attributes {dimension_semantics = [#tpu.dimension_semantics<arbitrary>, #tpu.dimension_semantics<arbitrary>, #tpu.dimension_semantics<arbitrary>], iteration_bounds = array<i64: 2, 1, 1>, scalar_prefetch = 0 : i64, scratch_operands = 2 : i64, tpu.core_type = #tpu.core_type<tc>, window_params = [{transform_indices = @transform_0, window_bounds = array<i64: 128, 128>}, {transform_indices = @transform_1, window_bounds = array<i64: 128, 128>}, {pipeline_mode = #tpu.pipeline_mode<synchronous>, transform_indices = @transform_2, window_bounds = array<i64: 3, 128, 128>}, {pipeline_mode = #tpu.pipeline_mode<synchronous>, transform_indices = @transform_3, window_bounds = array<i64: 1, 128>}, {pipeline_mode = #tpu.pipeline_mode<synchronous>, transform_indices = @transform_4, window_bounds = array<i64: 128, 128>}]} {
    %c128_i32 = arith.constant 128 : i32
    %0 = arith.muli %arg1, %c128_i32 : i32
    %1 = tpu.assume_multiple %0, 128 : i32
    %c128_i32_0 = arith.constant 128 : i32
    %2 = arith.muli %arg2, %c128_i32_0 : i32
    %3 = tpu.assume_multiple %2, 128 : i32
    %c2_i32 = arith.constant 2 : i32
    %c0_i32 = arith.constant 0 : i32
    %4 = arith.cmpi eq, %c2_i32, %c0_i32 : i32
    %c1_i32 = arith.constant 1 : i32
    %5 = arith.select %4, %c1_i32, %c2_i32 : i32
    %6 = arith.remsi %arg0, %5 : i32
    %c0_i32_1 = arith.constant 0 : i32
    %7 = arith.cmpi ne, %6, %c0_i32_1 : i32
    %c0_i32_2 = arith.constant 0 : i32
    %8 = arith.cmpi slt, %6, %c0_i32_2 : i32
    %c0_i32_3 = arith.constant 0 : i32
    %9 = arith.cmpi slt, %5, %c0_i32_3 : i32
    %10 = arith.xori %8, %9 : i1
    %11 = arith.andi %10, %7 : i1
    %12 = arith.addi %6, %5 : i32
    %13 = arith.select %11, %12, %6 : i32
    %c1_i32_4 = arith.constant 1 : i32
    %14 = arith.subi %c1_i32_4, %13 : i32
    %c0_i32_5 = arith.constant 0 : i32
    %15 = arith.cmpi eq, %arg0, %c0_i32_5 : i32
    %c0_i32_6 = arith.constant 0 : i32
    %16 = arith.cmpi eq, %arg1, %c0_i32_6 : i32
    %17 = arith.andi %15, %16 : i1
    %c0_i32_7 = arith.constant 0 : i32
    %18 = arith.cmpi eq, %arg2, %c0_i32_7 : i32
    %19 = arith.andi %17, %18 : i1
    %20 = arith.extui %19 : i1 to i32
    %c0_i32_8 = arith.constant 0 : i32
    %21 = arith.cmpi ne, %20, %c0_i32_8 : i32
    scf.if %21 {
      %cst_23 = arith.constant 0.000000e+00 : f32
      %43 = vector.broadcast %cst_23 : f32 to vector<128x128xf32>
      %c128 = arith.constant 128 : index
      %c0_24 = arith.constant 0 : index
      %44 = vector.load %arg9[%c128, %c0_24] : memref<256x128xf32, #tpu.memory_space<vmem>>, vector<128x128xf32>
      tpu.vector_store %arg9[%c128, %c0_24], %43 {strides = array<i32>} : memref<256x128xf32, #tpu.memory_space<vmem>>, vector<128x128xf32>,
    } else {
    }
    %c0_i32_9 = arith.constant 0 : i32
    %22 = arith.cmpi eq, %arg0, %c0_i32_9 : i32
    %c0_i32_10 = arith.constant 0 : i32
    %23 = arith.cmpi eq, %arg1, %c0_i32_10 : i32
    %24 = arith.andi %22, %23 : i1
    %25 = arith.extui %24 : i1 to i32
    %c0_i32_11 = arith.constant 0 : i32
    %26 = arith.cmpi ne, %25, %c0_i32_11 : i32
    scf.if %26 {
      %c0_23 = arith.constant 0 : index
      %c0_24 = arith.constant 0 : index
      %43 = vector.load %arg4[%c0_23, %c0_24] : memref<128x128xf32, #tpu.memory_space<vmem>>, vector<128x128xf32>
      %44 = arith.index_cast %3 : i32 to index
      %c0_25 = arith.constant 0 : index
      %45 = vector.load %arg9[%44, %c0_25] : memref<256x128xf32, #tpu.memory_space<vmem>>, vector<128x128xf32>
      tpu.vector_store %arg9[%44, %c0_25], %43 {strides = array<i32>} : memref<256x128xf32, #tpu.memory_space<vmem>>, vector<128x128xf32>,
    } else {
    }
    %c0_i32_12 = arith.constant 0 : i32
    %27 = arith.cmpi eq, %arg2, %c0_i32_12 : i32
    %28 = arith.extui %27 : i1 to i32
    %c0_i32_13 = arith.constant 0 : i32
    %29 = arith.cmpi ne, %28, %c0_i32_13 : i32
    scf.if %29 {
      %cst_23 = arith.constant 0.000000e+00 : f32
      %43 = vector.broadcast %cst_23 : f32 to vector<128x128xf32>
      %c0_24 = arith.constant 0 : index
      %c0_25 = arith.constant 0 : index
      %44 = vector.load %arg8[%c0_24, %c0_25] : memref<128x128xf32, #tpu.memory_space<vmem>>, vector<128x128xf32>
      tpu.vector_store %arg8[%c0_24, %c0_25], %43 {strides = array<i32>} : memref<128x128xf32, #tpu.memory_space<vmem>>, vector<128x128xf32>,
    } else {
    }
    %c128_i32_14 = arith.constant 128 : i32
    %30 = arith.muli %13, %c128_i32_14 : i32
    %31 = arith.addi %30, %3 : i32
    %32 = tpu.assume_multiple %31, 128 : i32
    %c0 = arith.constant 0 : index
    %c0_15 = arith.constant 0 : index
    %33 = vector.load %arg8[%c0, %c0_15] : memref<128x128xf32, #tpu.memory_space<vmem>>, vector<128x128xf32>
    %c0_16 = arith.constant 0 : index
    %c0_17 = arith.constant 0 : index
    %34 = vector.load %arg3[%c0_16, %c0_17] : memref<128x128xf32, #tpu.memory_space<vmem>>, vector<128x128xf32>
    %35 = arith.index_cast %32 : i32 to index
    %c0_18 = arith.constant 0 : index
    %36 = vector.load %arg9[%35, %c0_18] : memref<256x128xf32, #tpu.memory_space<vmem>>, vector<128x128xf32>
    %cst = arith.constant dense<0.000000e+00> : vector<128x128xf32>
    %37 = tpu.matmul %34, %36, %cst {dimension_numbers = #tpu.dot_dimension_numbers<[1], [0], [0], [1], [0, 0, 1, 1], [], []>} : vector<128x128xf32>, vector<128x128xf32>, vector<128x128xf32> -> vector<128x128xf32>
    %38 = arith.addf %33, %37 : vector<128x128xf32>
    %c0_19 = arith.constant 0 : index
    %c0_20 = arith.constant 0 : index
    %39 = vector.load %arg8[%c0_19, %c0_20] : memref<128x128xf32, #tpu.memory_space<vmem>>, vector<128x128xf32>
    tpu.vector_store %arg8[%c0_19, %c0_20], %38 {strides = array<i32>} : memref<128x128xf32, #tpu.memory_space<vmem>>, vector<128x128xf32>,
    %c0_i32_21 = arith.constant 0 : i32
    %40 = arith.cmpi eq, %arg2, %c0_i32_21 : i32
    %41 = arith.extui %40 : i1 to i32
    %c0_i32_22 = arith.constant 0 : i32
    %42 = arith.cmpi ne, %41, %c0_i32_22 : i32
    scf.if %42 {
      %c128_i32_23 = arith.constant 128 : i32
      %43 = arith.muli %14, %c128_i32_23 : i32
      %44 = arith.addi %43, %1 : i32
      %45 = tpu.assume_multiple %44, 128 : i32
      %46 = arith.index_cast %45 : i32 to index
      %c0_24 = arith.constant 0 : index
      %47 = vector.load %arg9[%46, %c0_24] : memref<256x128xf32, #tpu.memory_space<vmem>>, vector<128x128xf32>
      %c0_i32_25 = arith.constant 0 : i32
      %48 = arith.cmpi eq, %arg0, %c0_i32_25 : i32
      %cst_26 = arith.constant 1.000000e+00 : f32
      %cst_27 = arith.constant 2.000000e+00 : f32
      %49 = arith.select %48, %cst_26, %cst_27 : f32
      %c0_28 = arith.constant 0 : index
      %c0_29 = arith.constant 0 : index
      %50 = vector.load %arg8[%c0_28, %c0_29] : memref<128x128xf32, #tpu.memory_space<vmem>>, vector<128x128xf32>
      %51 = vector.broadcast %49 : f32 to vector<128x128xf32>
      %52 = arith.mulf %51, %50 : vector<128x128xf32>
      %53 = arith.subf %52, %47 : vector<128x128xf32>
      %54 = arith.index_cast %45 : i32 to index
      %c0_30 = arith.constant 0 : index
      %55 = vector.load %arg9[%54, %c0_30] : memref<256x128xf32, #tpu.memory_space<vmem>>, vector<128x128xf32>
      tpu.vector_store %arg9[%54, %c0_30], %53 {strides = array<i32>} : memref<256x128xf32, #tpu.memory_space<vmem>>, vector<128x128xf32>,
      %c1_i32_31 = arith.constant 1 : i32
      %56 = arith.addi %arg0, %c1_i32_31 : i32
      %57 = arith.index_cast %56 : i32 to index
      %c0_32 = arith.constant 0 : index
      %c0_33 = arith.constant 0 : index
      %58 = vector.load %arg5[%57, %c0_32, %c0_33] : memref<3x128x128xf32, #tpu.memory_space<vmem>>, vector<1x128x128xf32>
      %59 = vector.shape_cast %58 : vector<1x128x128xf32> to vector<128x128xf32>
      %cst_34 = arith.constant dense<0.000000e+00> : vector<128x128xf32>
      %60 = tpu.matmul %53, %59, %cst_34 {dimension_numbers = #tpu.dot_dimension_numbers<[1], [0], [0], [1], [0, 0, 1, 1], [], []>} : vector<128x128xf32>, vector<128x128xf32>, vector<128x128xf32> -> vector<128x128xf32>
      %c0_i32_35 = arith.constant 0 : i32
      %61 = arith.cmpi eq, %arg0, %c0_i32_35 : i32
      %62 = arith.extui %61 : i1 to i32
      %c0_i32_36 = arith.constant 0 : i32
      %63 = arith.cmpi ne, %62, %c0_i32_36 : i32
      scf.if %63 {
        %67 = arith.index_cast %1 : i32 to index
        %c0_39 = arith.constant 0 : index
        %68 = vector.load %arg9[%67, %c0_39] : memref<256x128xf32, #tpu.memory_space<vmem>>, vector<128x128xf32>
        %c0_40 = arith.constant 0 : index
        %c0_41 = arith.constant 0 : index
        %69 = vector.load %arg6[%c0_40, %c0_41] : memref<1x128xf32, #tpu.memory_space<vmem>>, vector<1x128xf32>
        %c0_42 = arith.constant 0 : index
        %c0_43 = arith.constant 0 : index
        %c0_44 = arith.constant 0 : index
        %70 = vector.load %arg5[%c0_42, %c0_43, %c0_44] : memref<3x128x128xf32, #tpu.memory_space<vmem>>, vector<1x128x128xf32>
        %71 = vector.shape_cast %70 : vector<1x128x128xf32> to vector<128x128xf32>
        %cst_45 = arith.constant dense<0.000000e+00> : vector<128x128xf32>
        %72 = tpu.matmul %68, %71, %cst_45 {dimension_numbers = #tpu.dot_dimension_numbers<[1], [0], [0], [1], [0, 0, 1, 1], [], []>} : vector<128x128xf32>, vector<128x128xf32>, vector<128x128xf32> -> vector<128x128xf32>
        %73 = vector.broadcast %69 : vector<1x128xf32> to vector<128x128xf32>
        %74 = arith.addf %73, %72 : vector<128x128xf32>
        %75 = arith.addf %74, %60 : vector<128x128xf32>
        %76 = arith.index_cast %1 : i32 to index
        %c0_46 = arith.constant 0 : index
        %77 = vector.load %arg7[%76, %c0_46] : memref<128x128xf32, #tpu.memory_space<vmem>>, vector<128x128xf32>
        tpu.vector_store %arg7[%76, %c0_46], %75 {strides = array<i32>} : memref<128x128xf32, #tpu.memory_space<vmem>>, vector<128x128xf32>,
      } else {
      }
      %c0_i32_37 = arith.constant 0 : i32
      %64 = arith.cmpi sgt, %arg0, %c0_i32_37 : i32
      %65 = arith.extui %64 : i1 to i32
      %c0_i32_38 = arith.constant 0 : i32
      %66 = arith.cmpi ne, %65, %c0_i32_38 : i32
      scf.if %66 {
        %67 = arith.index_cast %1 : i32 to index
        %c0_39 = arith.constant 0 : index
        %68 = vector.load %arg7[%67, %c0_39] : memref<128x128xf32, #tpu.memory_space<vmem>>, vector<128x128xf32>
        %69 = arith.addf %68, %60 : vector<128x128xf32>
        %70 = arith.index_cast %1 : i32 to index
        %c0_40 = arith.constant 0 : index
        %71 = vector.load %arg7[%70, %c0_40] : memref<128x128xf32, #tpu.memory_space<vmem>>, vector<128x128xf32>
        tpu.vector_store %arg7[%70, %c0_40], %69 {strides = array<i32>} : memref<128x128xf32, #tpu.memory_space<vmem>>, vector<128x128xf32>,
      } else {
      }
    } else {
    }
    return
  }
  func.func @transform_0(%arg0: i32, %arg1: i32, %arg2: i32) -> (i32, i32) {
    %c0_i32 = arith.constant 0 : i32
    return %arg1, %arg2 : i32, i32
  }
  func.func @transform_1(%arg0: i32, %arg1: i32, %arg2: i32) -> (i32, i32) {
    %0 = arith.addi %arg0, %arg1 : i32
    %c1_i32 = arith.constant 1 : i32
    %1 = arith.minsi %0, %c1_i32 : i32
    %c1_i32_0 = arith.constant 1 : i32
    %2 = arith.subi %c1_i32_0, %1 : i32
    %3 = arith.muli %arg2, %2 : i32
    %c0_i32 = arith.constant 0 : i32
    %c0_i32_1 = arith.constant 0 : i32
    return %3, %c0_i32 : i32, i32
  }
  func.func @transform_2(%arg0: i32, %arg1: i32, %arg2: i32) -> (i32, i32, i32) {
    %c0_i32 = arith.constant 0 : i32
    %c0_i32_0 = arith.constant 0 : i32
    %c0_i32_1 = arith.constant 0 : i32
    %c0_i32_2 = arith.constant 0 : i32
    return %c0_i32, %c0_i32_0, %c0_i32_1 : i32, i32, i32
  }
  func.func @transform_3(%arg0: i32, %arg1: i32, %arg2: i32) -> (i32, i32) {
    %c0_i32 = arith.constant 0 : i32
    %c0_i32_0 = arith.constant 0 : i32
    %c0_i32_1 = arith.constant 0 : i32
    return %c0_i32, %c0_i32_0 : i32, i32
  }
  func.func @transform_4(%arg0: i32, %arg1: i32, %arg2: i32) -> (i32, i32) {
    %c0_i32 = arith.constant 0 : i32
    %c0_i32_0 = arith.constant 0 : i32
    %c0_i32_1 = arith.constant 0 : i32
    return %c0_i32, %c0_i32_0 : i32, i32
  }
}

</mosaic_0001>

<bundles_post_ra>
// kernel: tpu_custom_call.1
= control target key start
LH: loop header
LB: loop body
LE: loop exit
PB: predicated region body
PF: predicated region fallthrough
CT: control target
= control target key end

     0   :  { %9 = vsyncpa [#allocation5], 0  ;;  %s2277_s0 = inlined_call_operand.hbm [shape: f32[128,128], index: 0, kind: input, shape index: {}]   ;;  %s2278_s1 = inlined_call_operand.hbm [shape: f32[128,128], index: 1, kind: input, shape index: {}]   ;;  %s2279_s2 = inlined_call_operand.hbm [shape: f32[3,128,128], index: 2, kind: input, shape index: {}]   ;;  %s2280_s3 = inlined_call_operand.vmem [shape: f32[1,128], index: 3, kind: input, shape index: {}]   ;;  %s2281_s4 = inlined_call_operand.hbm [shape: f32[128,128], index: 4, kind: output, shape index: {}]  }
   0x1   :  { %10 = vsyncpa [#allocation8], 0 }
   0x2   :  { %12 = vsyncpa [#allocation8 + $0x1], 0 }
   0x3   :  { %13 = vsyncpa [#allocation6], 0  ;;  %s1936_s15 = smov 0   ;;  %s1938_s16 = smov 0  }
   0x4   :  { %s1940_s17 = smov 0  }
   0x5 LB: > { %s1952_s18 = sadd.s32 4294967295, %s1900_s17   ;;  %p1265_p0 = scmp.ge.s32.totalorder %s1900_s17, 1  ;;  %s1900_s17 = sphi %s1940_s17, %s19_s17   ;;  %s1896_s16 = sphi %s1938_s16, %s2299_s16   ;;  %s1892_s15 = sphi %s1936_s15, %s2298_s15  }
   0x6   : > { %p170_p1 = scmp.lt.s32.totalorder %s1900_s17, 3  ;;  %p2282_p2 = scmp.eq.s32.totalorder %s1952_s18, 0 }
   0x7   : > { %s1902_s20 = smov [#allocation9]   ;;  %s38_s23 = sadd.s32 1, %s1896_s16 }
   0x8   : > { %p1957_p3 = pnand %p1265_p0, %p170_p1  ;;  %s199_s21 = sshll.u32 %s1902_s20, 4  ;;  %s200_s21 = int_to_ptr.vmem [resolvable:$true] %s199_s21 }
   0x9   : > { %p1970_p6 = scmp.ge.s32.totalorder %s38_s23, 2  ;;  %s1752_s27 = scalar_lea.hbm %s2279_s2, 6144 }
   0xa   : > { %s2284_s19 = scalar_select %p1957_p3, 1, 0 }
   0xb   : > { %p1699_p4 = pneg %p1957_p3  ;;  %p1753_p7 = scmp.ne.s32.totalorder %s2279_s2, %s1752_s27 }
   0xc   : > { %s2286_s24 = scalar_select %p1970_p6, 1, 0 }
   0xd   : > { %p1965_p5 = pnand %p2282_p2, %p1699_p4  ;;  %p1759_p11 = scmp.lt.u32.totalorder %s1752_s27, %s2279_s2 }
   0xf   : > { %p1754_p8 = pneg %p1965_p5 }
  0x11   : > { %p1755_p9 = pnand %p1754_p8, %p1753_p7 }
  0x13   : > { %p1756_p10 = pneg %p1755_p9 }
  0x15   : > { %p1761_p12 = pnand %p1759_p11, %p1756_p10 }
  0x17   : > { %1764 = shalt.err (!%p1761_p12)
}
  0x18   : > { %s1765_s6 = scalar_lea.vmem %s200_s21, 6144  ;;  %p1773_p4 = scmp.lt.s32.totalorder %s200_s21, %s200_s21 }
  0x19   : > { %p1766_p13 = scmp.ne.s32.totalorder %s200_s21, %s1765_s6  ;;  %p1774_p2 = scmp.lt.s32.totalorder %s1765_s6, %s1765_s6 }
  0x1b   : > { %p1768_p0 = pnand %p1766_p13, %p1754_p8  ;;  %p1775_p3 = por %p1774_p2, %p1773_p4 }
  0x1d   : > { %p1769_p1 = pneg %p1768_p0 }
  0x1f   : > { %p1776_p6 = pnand %p1775_p3, %p1769_p1 }
  0x21   : > { %1779 = shalt.err (!%p1776_p6)
}
  0x22   : > { %s1903_s7 = smov 128   ;;  %s1904_s8 = smov 8  }
  0x23   : > { %1705 = dma.hbm_to_vmem [thread:$0]  (!%p1965_p5), %s2279_s2, 6144, %s200_s21, [#allocation8], %s1903_s7, %s1903_s7, %s1904_s8  }
  0x24   : > { %p2287_p7 = scmp.ne.s32.totalorder %s2286_s24, 0  ;;  %s1905_s11 = smov [#allocation4]  }
  0x25   : > { %s186_s12 = sshll.u32 %s1905_s11, 4  ;;  %s216_s13 = sand.u32 1, %s1900_s17   ;;  %s187_s12 = int_to_ptr.vmem [resolvable:$true] %s186_s12 }
  0x26   : > { %s2301_s23 = smov (%p2287_p7, %s38_s23), 0  ;;  %s1780_s25 = scalar_lea.hbm %s2277_s0, 2048 }
  0x27   : > { %p1781_p6 = scmp.ne.s32.totalorder %s2277_s0, %s1780_s25  ;;  %p1787_p11 = scmp.lt.u32.totalorder %s1780_s25, %s2277_s0 }
  0x29   : > { %p1783_p9 = pnand %p1781_p6, %p1754_p8 }
  0x2b   : > { %p1784_p10 = pneg %p1783_p9 }
  0x2d   : > { %p1789_p12 = pnand %p1787_p11, %p1784_p10 }
  0x2f   : > { %1792 = shalt.err (!%p1789_p12)
}
  0x30   : > { %s1793_s28 = scalar_lea.vmem %s187_s12, 2048  ;;  %p1801_p4 = scmp.lt.s32.totalorder %s187_s12, %s187_s12 }
  0x31   : > { %p1794_p13 = scmp.ne.s32.totalorder %s187_s12, %s1793_s28  ;;  %p1802_p7 = scmp.lt.s32.totalorder %s1793_s28, %s1793_s28 }
  0x33   : > { %p1796_p0 = pnand %p1794_p13, %p1754_p8  ;;  %p1803_p3 = por %p1802_p7, %p1801_p4 }
  0x35   : > { %p1797_p1 = pneg %p1796_p0 }
  0x37   : > { %p1804_p2 = pnand %p1803_p3, %p1797_p1 }
  0x39   : > { %1807 = shalt.err (!%p1804_p2)
}
  0x3a   : > { %1702 = dma.hbm_to_vmem [thread:$0]  (!%p1965_p5), %s2277_s0, 2048, %s187_s12, [#allocation5], %s1903_s7, %s1903_s7, %s1904_s8  }
  0x3b   : > { %s1906_s5 = smov [#allocation7]   ;;  %p2288_p8 = scmp.lt.s32.totalorder %s1900_s17, 2 }
  0x3c   : > { %s232_s6 = sshll.u32 %s1906_s5, 4  ;;  %p2289_p6 = scmp.eq.s32.totalorder %s1900_s17, 0  ;;  %s233_s6 = int_to_ptr.vmem [resolvable:$true] %s232_s6 }
  0x3d   : > { %s217_s22 = scalar_lea.sflag [#allocation8], %s216_s13  ;;  %s1808_s14 = scalar_lea.hbm %s2278_s1, 2048 }
  0x3e   : > { %p2033_p9 = pnand %p2289_p6, %p2288_p8  ;;  %p1809_p2 = scmp.ne.s32.totalorder %s2278_s1, %s1808_s14 }
  0x3f   : > { %p1815_p11 = scmp.lt.u32.totalorder %s1808_s14, %s2278_s1 }
  0x40   : > { %p1810_p5 = pneg %p2033_p9 }
  0x42   : > { %p1811_p3 = pnand %p1810_p5, %p1809_p2 }
  0x44   : > { %p1812_p10 = pneg %p1811_p3 }
  0x46   : > { %p1817_p12 = pnand %p1815_p11, %p1812_p10 }
  0x48   : > { %1820 = shalt.err (!%p1817_p12)
}
  0x49   : > { %s1821_s27 = scalar_lea.vmem %s233_s6, 2048  ;;  %s1828_s13 = scalar_lea.vmem %s233_s6, 4096 }
  0x4a   : > { %p1822_p13 = scmp.ne.s32.totalorder %s233_s6, %s1821_s27  ;;  %p1829_p4 = scmp.lt.s32.totalorder %s233_s6, %s233_s6 }
  0x4b   : > { %p1830_p7 = scmp.lt.s32.totalorder %s1828_s13, %s1821_s27 }
  0x4c   : > { %p1824_p0 = pnand %p1822_p13, %p1810_p5 }
  0x4d   : > { %p1831_p8 = por %p1830_p7, %p1829_p4 }
  0x4e   : > { %p1825_p1 = pneg %p1824_p0 }
  0x50   : > { %p1832_p6 = pnand %p1831_p8, %p1825_p1 }
  0x52   : > { %1835 = shalt.err (!%p1832_p6)
}
  0x53   : > { %1709 = dma.hbm_to_vmem [thread:$0]  (!%p2033_p9), %s2278_s1, 2048, %s233_s6, %s217_s22, %s1903_s7, %s1903_s7, %s1904_s8  }
  0x54   : > { %p2291_p2 = scmp.ne.s32.totalorder %s2284_s19, 0 }
  0x55   : > { %p2292_p5 = scmp.eq.s32.totalorder (!%p2291_p2), %s1952_s18, 0 }
  0x56   : > { %244 = sbr.rel (%p2291_p2) target bundleno = 860 (0x35c), region = 36 }
  0x5d   : > { %1875 = dma.done.wait (%p2292_p5), [#allocation5], 2048   ;;  %p2293_p3 = pmov %p2292_p5 }
  0x5e   : > { %s250_s28 = sand.u32 1, %s1952_s18  }
  0x5f   : > { %1877 = vsyncadd (%p2293_p3), [#allocation5], 4294965248  ;;  %s251_s29 = scalar_lea.sflag [#allocation8], %s250_s28  ;;  %p2294_p10 = pmov %p2293_p3 }
  0x60   : > { %p2295_p11 = pmov %p2293_p3 }
  0x61   : > { %1879 = dma.done.wait (%p2294_p10), %s251_s29, 2048  }
  0x62   : > { %1881 = vsyncadd (%p2295_p11), %s251_s29, 4294965248  ;;  %p2296_p9 = pmov %p2293_p3 }
  0x63   : > { %p2297_p12 = pmov %p2293_p3 }
  0x64   : > { %1883 = dma.done.wait (%p2296_p9), [#allocation8], 6144  }
  0x65   : > { %1885 = vsyncadd (%p2297_p12), [#allocation8], 4294961152  ;;  %p287_p13 = scmp.lt.s32.totalorder %s1892_s15, 0  ;;  %s288_s19 = ssub.s32 0, %s1892_s15 }
  0x66   : > { %s1274_s7 = smin.u32 %s1892_s15, %s288_s19  ;;  %p300_p0 = scmp.eq.s32.totalorder %s1892_s15, 0 }
  0x67   : > { %s290_s8 = sand.u32 1, %s1274_s7   ;;  %v1907_v0 = vmov (%p300_p0), 0.0  }
  0x68   : > { %s291_s30 = ssub.s32 0, %s290_s8  ;;  %308 = sbr.rel (!%p300_p0) target bundleno = 112 (0x70), region = 52  ;;  %309 = vst [vmem:[#allocation3 + $0x80] sm:$0xff] (%p300_p0), %v1907_v0  ;;  %310 = vst [vmem:[#allocation3 + $0x88] sm:$0xff] (%p300_p0), %v1907_v0 }
  0x69   : > { %s2303_s30 = smov (!%p287_p13, %s291_s30), %s290_s8  ;;  %311 = vst [vmem:[#allocation3 + $0x90] sm:$0xff] (%p300_p0), %v1907_v0  ;;  %312 = vst [vmem:[#allocation3 + $0x98] sm:$0xff] (%p300_p0), %v1907_v0 }
  0x6a   : > { %p1276_p1 = scmp.lt.s32.totalorder %s2303_s30, 0  ;;  %s297_s5 = sadd.s32 2, %s2303_s30  ;;  %313 = vst [vmem:[#allocation3 + $0xa0] sm:$0xff] (%p300_p0), %v1907_v0  ;;  %314 = vst [vmem:[#allocation3 + $0xa8] sm:$0xff] (%p300_p0), %v1907_v0 }
  0x6b   : > { %315 = vst [vmem:[#allocation3 + $0xb0] sm:$0xff] (%p300_p0), %v1907_v0  ;;  %316 = vst [vmem:[#allocation3 + $0xb8] sm:$0xff] (%p300_p0), %v1907_v0 }
  0x6c   : > { %s2305_s5 = smov (!%p1276_p1, %s297_s5), %s2303_s30  ;;  %317 = vst [vmem:[#allocation3 + $0xc0] sm:$0xff] (%p300_p0), %v1907_v0  ;;  %318 = vst [vmem:[#allocation3 + $0xc8] sm:$0xff] (%p300_p0), %v1907_v0 }
  0x6d   : > { %s299_s6 = ssub.s32 1, %s2305_s5  ;;  %319 = vst [vmem:[#allocation3 + $0xd0] sm:$0xff] (%p300_p0), %v1907_v0  ;;  %320 = vst [vmem:[#allocation3 + $0xd8] sm:$0xff] (%p300_p0), %v1907_v0 }
  0x6e   : > { %321 = vst [vmem:[#allocation3 + $0xe0] sm:$0xff] (%p300_p0), %v1907_v0  ;;  %322 = vst [vmem:[#allocation3 + $0xe8] sm:$0xff] (%p300_p0), %v1907_v0 }
  0x6f   : > { %323 = vst [vmem:[#allocation3 + $0xf0] sm:$0xff] %v1907_v0  ;;  %324 = vst [vmem:[#allocation3 + $0xf8] sm:$0xff] %v1907_v0 }
  0x70 PF: > { %326 = sbr.rel (!%p300_p0) target bundleno = 121 (0x79), region = 56  ;;  %v327_v1 = vld [vmem:[#allocation7] sm:$0xff] (%p300_p0)  ;;  %v328_v2 = vld [vmem:[#allocation7 + $0x8] sm:$0xff] (%p300_p0)  ;;  %v329_v3 = vld [vmem:[#allocation7 + $0x10] sm:$0xff] (%p300_p0) }
  0x71   : > { %344 = vst [vmem:[#allocation3] sm:$0xff] (%p300_p0), %v327_v1  ;;  %345 = vst [vmem:[#allocation3 + $0x8] sm:$0xff] (%p300_p0), %v328_v2  ;;  %v330_v4 = vld [vmem:[#allocation7 + $0x18] sm:$0xff] (%p300_p0)  ;;  %v331_v5 = vld [vmem:[#allocation7 + $0x20] sm:$0xff] (%p300_p0) }
  0x72   : > { %346 = vst [vmem:[#allocation3 + $0x10] sm:$0xff] (%p300_p0), %v329_v3  ;;  %v332_v6 = vld [vmem:[#allocation7 + $0x28] sm:$0xff] (%p300_p0)  ;;  %347 = vst [vmem:[#allocation3 + $0x18] sm:$0xff] (%p300_p0), %v330_v4  ;;  %v333_v7 = vld [vmem:[#allocation7 + $0x30] sm:$0xff] (%p300_p0) }
  0x73   : > { %348 = vst [vmem:[#allocation3 + $0x20] sm:$0xff] (%p300_p0), %v331_v5  ;;  %349 = vst [vmem:[#allocation3 + $0x28] sm:$0xff] (%p300_p0), %v332_v6  ;;  %v334_v8 = vld [vmem:[#allocation7 + $0x38] sm:$0xff] (%p300_p0)  ;;  %v335_v9 = vld [vmem:[#allocation7 + $0x40] sm:$0xff] (%p300_p0) }
  0x74   : > { %350 = vst [vmem:[#allocation3 + $0x30] sm:$0xff] (%p300_p0), %v333_v7  ;;  %351 = vst [vmem:[#allocation3 + $0x38] sm:$0xff] (%p300_p0), %v334_v8  ;;  %v336_v10 = vld [vmem:[#allocation7 + $0x48] sm:$0xff] (%p300_p0)  ;;  %v337_v11 = vld [vmem:[#allocation7 + $0x50] sm:$0xff] (%p300_p0) }
  0x75   : > { %352 = vst [vmem:[#allocation3 + $0x40] sm:$0xff] (%p300_p0), %v335_v9  ;;  %v338_v12 = vld [vmem:[#allocation7 + $0x58] sm:$0xff] (%p300_p0)  ;;  %353 = vst [vmem:[#allocation3 + $0x48] sm:$0xff] (%p300_p0), %v336_v10  ;;  %v339_v13 = vld [vmem:[#allocation7 + $0x60] sm:$0xff] (%p300_p0) }
  0x76   : > { %354 = vst [vmem:[#allocation3 + $0x50] sm:$0xff] (%p300_p0), %v337_v11  ;;  %355 = vst [vmem:[#allocation3 + $0x58] sm:$0xff] (%p300_p0), %v338_v12  ;;  %v340_v14 = vld [vmem:[#allocation7 + $0x68] sm:$0xff] (%p300_p0)  ;;  %v341_v15 = vld [vmem:[#allocation7 + $0x70] sm:$0xff] (%p300_p0) }
  0x77   : > { %356 = vst [vmem:[#allocation3 + $0x60] sm:$0xff] %v339_v13  ;;  %357 = vst [vmem:[#allocation3 + $0x68] sm:$0xff] %v340_v14  ;;  %v342_v16 = vld [vmem:[#allocation7 + $0x78] sm:$0xff] }
  0x78   : > { %358 = vst [vmem:[#allocation3 + $0x70] sm:$0xff] %v341_v15  ;;  %359 = vst [vmem:[#allocation3 + $0x78] sm:$0xff] %v342_v16 }
  0x79 PF: > { %s1279_s9 = sshll.u32 %s2305_s5, 7  ;;  %v397_v17 = vld [vmem:[#allocation4] sm:$0xff]  ;;  %s1281_s10 = sshll.u32 %s1892_s15, 7  ;;  %v398_v63 = vld [vmem:[#allocation4 + $0x8] sm:$0xff]  ;;  %v399_v0 = vld [vmem:[#allocation4 + $0x10] sm:$0xff] }
  0x7a   : > { %1435 = vmatprep.mubr.f32.mxu0 %v397_v17  ;;  %s2083_s22 = scalar_lea.vmem [#allocation3], %s1279_s9  ;;  %s2094_s11 = scalar_lea.vmem [#allocation9], %s1281_s10  ;;  %v400_v1 = vld [vmem:[#allocation4 + $0x18] sm:$0xff]  ;;  %v401_v2 = vld [vmem:[#allocation4 + $0x20] sm:$0xff]  ;;  %v402_v3 = vld [vmem:[#allocation4 + $0x28] sm:$0xff] }
  0x7b   : > { %v1282_v29 = vld [vmem:[%s2094_s11 + $0x80] sm:$0xff]  ;;  %v1283_v31 = vld [vmem:[%s2094_s11 + $0x88] sm:$0xff]  ;;  %v1284_v32 = vld [vmem:[%s2094_s11 + $0x90] sm:$0xff]  ;;  %s629_s14 = scalar_select %p300_p0, 1.0, 2.0 }
  0x7c   : > { %v1285_v33 = vld [vmem:[%s2094_s11 + $0x98] sm:$0xff]  ;;  %v1603_v36 = vpack.c.bf16 %v1283_v31, %v1282_v29  ;;  %v1286_v38 = vld [vmem:[%s2094_s11 + $0xa0] sm:$0xff]  ;;  %v1287_v39 = vld [vmem:[%s2094_s11 + $0xa8] sm:$0xff]  ;;  %s1280_s20 = sshll.u32 %s299_s6, 7  ;;  %p1298_p4 = scmp.ne.s32.totalorder %s1892_s15, 0 }
  0x7d   : > { %v1607_v37 = vpack.c.bf16 %v1285_v33, %v1284_v32  ;;  %v1611_v43 = vpack.c.bf16 %v1287_v39, %v1286_v38  ;;  %v1288_v44 = vld [vmem:[%s2094_s11 + $0xb0] sm:$0xff]  ;;  %v1289_v45 = vld [vmem:[%s2094_s11 + $0xb8] sm:$0xff]  ;;  %v1290_v50 = vld [vmem:[%s2094_s11 + $0xc0] sm:$0xff]  ;;  %v2124_v17 = vstv %s629_s14  ;;  %s2126_s25 = scalar_lea.vmem [#allocation3], %s1280_s20 }
  0x7e   : > { %1604 = vmatprep.subr.bf16.mxu1 %v1603_v36  ;;  %v1615_v49 = vpack.c.bf16 %v1289_v45, %v1288_v44  ;;  %v1291_v51 = vld [vmem:[%s2094_s11 + $0xc8] sm:$0xff]  ;;  %v1292_v56 = vld [vmem:[%s2094_s11 + $0xd0] sm:$0xff]  ;;  %v1293_v57 = vld [vmem:[%s2094_s11 + $0xd8] sm:$0xff] }
  0x7f   : > { %v414_v18 = vld [vmem:[%s2083_s22] sm:$0xff]  ;;  %v415_v19 = vld [vmem:[%s2083_s22 + $0x8] sm:$0xff]  ;;  %v416_v20 = vld [vmem:[%s2083_s22 + $0x10] sm:$0xff]  ;;  %1606 = vmatpush3.bf16.msra.mxu1 %v1603_v36  ;;  %v1619_v55 = vpack.c.bf16 %v1291_v51, %v1290_v50  ;;  %v1623_v59 = vpack.c.bf16 %v1293_v57, %v1292_v56 }
  0x80   : > { %v1571_v21 = vpack.c.bf16 %v415_v19, %v414_v18  ;;  %v417_v22 = vld [vmem:[%s2083_s22 + $0x18] sm:$0xff]  ;;  %v418_v24 = vld [vmem:[%s2083_s22 + $0x20] sm:$0xff]  ;;  %v419_v25 = vld [vmem:[%s2083_s22 + $0x28] sm:$0xff]  ;;  %1608 = vmatprep.subr.bf16.mxu1 %v1607_v37 }
  0x81   : > { %v1575_v23 = vpack.c.bf16 %v417_v22, %v416_v20  ;;  %v1579_v26 = vpack.c.bf16 %v419_v25, %v418_v24  ;;  %v420_v27 = vld [vmem:[%s2083_s22 + $0x30] sm:$0xff]  ;;  %v421_v28 = vld [vmem:[%s2083_s22 + $0x38] sm:$0xff]  ;;  %v422_v34 = vld [vmem:[%s2083_s22 + $0x40] sm:$0xff] }
  0x82   : > { %1572 = vmatprep.subr.bf16.mxu0 %v1571_v21  ;;  %v1583_v30 = vpack.c.bf16 %v421_v28, %v420_v27  ;;  %v423_v35 = vld [vmem:[%s2083_s22 + $0x48] sm:$0xff]  ;;  %v424_v41 = vld [vmem:[%s2083_s22 + $0x50] sm:$0xff]  ;;  %v425_v42 = vld [vmem:[%s2083_s22 + $0x58] sm:$0xff] }
  0x83   : > { %1574 = vmatpush3.bf16.msra.mxu0 %v1571_v21  ;;  %v1587_v40 = vpack.c.bf16 %v423_v35, %v422_v34  ;;  %v1591_v46 = vpack.c.bf16 %v425_v42, %v424_v41  ;;  %1610 = vmatpush3.bf16.msra.mxu1 %v1607_v37  ;;  %v426_v47 = vld [vmem:[%s2083_s22 + $0x60] sm:$0xff]  ;;  %v427_v48 = vld [vmem:[%s2083_s22 + $0x68] sm:$0xff]  ;;  %v428_v53 = vld [vmem:[%s2083_s22 + $0x70] sm:$0xff] }
  0x84   : > { %1576 = vmatprep.subr.bf16.mxu0 %v1575_v23  ;;  %1612 = vmatprep.subr.bf16.mxu1 %v1611_v43  ;;  %v1595_v52 = vpack.c.bf16 %v427_v48, %v426_v47  ;;  %v429_v54 = vld [vmem:[%s2083_s22 + $0x78] sm:$0xff]  ;;  %v1294_v60 = vld [vmem:[%s2094_s11 + $0xe0] sm:$0xff]  ;;  %v1295_v61 = vld [vmem:[%s2094_s11 + $0xe8] sm:$0xff] }
  0x85   : > { %v1599_v58 = vpack.c.bf16 %v429_v54, %v428_v53  ;;  %v1627_v62 = vpack.c.bf16 %v1295_v61, %v1294_v60  ;;  %v403_v4 = vld [vmem:[#allocation4 + $0x30] sm:$0xff]  ;;  %v404_v5 = vld [vmem:[#allocation4 + $0x38] sm:$0xff]  ;;  %v405_v6 = vld [vmem:[#allocation4 + $0x40] sm:$0xff] }
  0x86   : > { %v406_v7 = vld [vmem:[#allocation4 + $0x48] sm:$0xff]  ;;  %v407_v8 = vld [vmem:[#allocation4 + $0x50] sm:$0xff]  ;;  %v408_v9 = vld [vmem:[#allocation4 + $0x58] sm:$0xff] }
  0x87   : > { %1578 = vmatpush3.bf16.msra.mxu0 %v1575_v23  ;;  %1614 = vmatpush3.bf16.msra.mxu1 %v1611_v43  ;;  %v409_v10 = vld [vmem:[#allocation4 + $0x60] sm:$0xff]  ;;  %v410_v11 = vld [vmem:[#allocation4 + $0x68] sm:$0xff]  ;;  %v411_v12 = vld [vmem:[#allocation4 + $0x70] sm:$0xff] }
  0x88   : > { %1580 = vmatprep.subr.bf16.mxu0 %v1579_v26  ;;  %1616 = vmatprep.subr.bf16.mxu1 %v1615_v49  ;;  %v412_v13 = vld [vmem:[#allocation4 + $0x78] sm:$0xff]  ;;  %v1296_v14 = vld [vmem:[%s2094_s11 + $0xf0] sm:$0xff]  ;;  %v614_v19 = vld [vmem:[%s2126_s25 + $0x8] sm:$0xff] }
  0x89   : > { %v1297_v15 = vld [vmem:[%s2094_s11 + $0xf8] sm:$0xff]  ;;  %v613_v22 = vld [vmem:[%s2126_s25] sm:$0xff]  ;;  %v618_v35 = vld [vmem:[%s2126_s25 + $0x28] sm:$0xff] }
  0x8a   : > { %v1631_v16 = vpack.c.bf16 %v1297_v15, %v1296_v14  ;;  %v617_v38 = vld [vmem:[%s2126_s25 + $0x20] sm:$0xff]  ;;  %v620_v43 = vld [vmem:[%s2126_s25 + $0x38] sm:$0xff]  ;;  %v622_v51 = vld [vmem:[%s2126_s25 + $0x48] sm:$0xff] }
  0x8b   : > { %1582 = vmatpush3.bf16.msra.mxu0 %v1579_v26  ;;  %1618 = vmatpush3.bf16.msra.mxu1 %v1615_v49  ;;  %v616_v26 = vld [vmem:[%s2126_s25 + $0x18] sm:$0xff]  ;;  %v621_v54 = vld [vmem:[%s2126_s25 + $0x40] sm:$0xff]  ;;  %v627_v14 = vld [vmem:[%s2126_s25 + $0x70] sm:$0xff] }
  0x8c   : > { %1584 = vmatprep.subr.bf16.mxu0 %v1583_v30  ;;  %1620 = vmatprep.subr.bf16.mxu1 %v1619_v55 }
  0x8f   : > { %1586 = vmatpush3.bf16.msra.mxu0 %v1583_v30  ;;  %1622 = vmatpush3.bf16.msra.mxu1 %v1619_v55  ;;  %v615_v30 = vld [vmem:[%s2126_s25 + $0x10] sm:$0xff] }
  0x90   : > { %1588 = vmatprep.subr.bf16.mxu0 %v1587_v40  ;;  %1624 = vmatprep.subr.bf16.mxu1 %v1623_v59 }
  0x93   : > { %1590 = vmatpush3.bf16.msra.mxu0 %v1587_v40  ;;  %1626 = vmatpush3.bf16.msra.mxu1 %v1623_v59  ;;  %v624_v59 = vld [vmem:[%s2126_s25 + $0x58] sm:$0xff] }
  0x94   : > { %1592 = vmatprep.subr.bf16.mxu0 %v1591_v46  ;;  %1628 = vmatprep.subr.bf16.mxu1 %v1627_v62 }
  0x97   : > { %1594 = vmatpush3.bf16.msra.mxu0 %v1591_v46  ;;  %1630 = vmatpush3.bf16.msra.mxu1 %v1627_v62  ;;  %v619_v46 = vld [vmem:[%s2126_s25 + $0x30] sm:$0xff] }
  0x98   : > { %1596 = vmatprep.subr.bf16.mxu0 %v1595_v52  ;;  %1632 = vmatprep.subr.bf16.mxu1 %v1631_v16  ;;  %v623_v62 = vld [vmem:[%s2126_s25 + $0x50] sm:$0xff] }
  0x9b   : > { %1598 = vmatpush3.bf16.msra.mxu0 %v1595_v52  ;;  %1634 = vmatpush3.bf16.msra.mxu1 %v1631_v16 }
  0x9c   : > { %1600 = vmatprep.subr.bf16.mxu0 %v1599_v58 }
  0x9f   : > { %1602 = vmatpush3.bf16.msra.mxu0 %v1599_v58 }
  0xa2   : > { %1436 = vmatmul.mubr.f32.vlgmr.msra.gmra.mrb[0].mxu0 %v398_v63 }
  0xa3   : > { %1438 = vmatprep.mubr.f32.mxu0 %v399_v0 }
  0xa6   : > { %1439 = vmatmul.mubr.f32.gmra.mrb[2].mxu0 %v400_v1 }
  0xa7   : > { %1441 = vmatprep.mubr.f32.mxu0 %v401_v2 }
  0xaa   : > { %1442 = vmatmul.mubr.f32.gmra.mrb[4].mxu0 %v402_v3  ;;  %v626_v3 = vld [vmem:[%s2126_s25 + $0x68] sm:$0xff] }
  0xab   : > { %1444 = vmatprep.mubr.f32.mxu0 %v403_v4 }
  0xae   : > { %1445 = vmatmul.mubr.f32.gmra.mrb[6].mxu0 %v404_v5 }
  0xaf   : > { %1447 = vmatprep.mubr.f32.mxu0 %v405_v6  ;;  %v625_v6 = vld [vmem:[%s2126_s25 + $0x60] sm:$0xff] }
  0xb2   : > { %1448 = vmatmul.mubr.f32.gmra.mrb[8].mxu0 %v406_v7 }
  0xb3   : > { %1450 = vmatprep.mubr.f32.mxu0 %v407_v8 }
  0xb6   : > { %1451 = vmatmul.mubr.f32.gmra.mrb[10].mxu0 %v408_v9 }
  0xb7   : > { %1453 = vmatprep.mubr.f32.mxu0 %v409_v10 }
  0xba   : > { %1454 = vmatmul.mubr.f32.gmra.mrb[12].mxu0 %v410_v11  ;;  %v628_v11 = vld [vmem:[%s2126_s25 + $0x78] sm:$0xff] }
  0xbb   : > { %1456 = vmatprep.mubr.f32.mxu0 %v411_v12 }
  0xbe   : > { %1457 = vmatmul.mubr.f32.gmra.mrb[14].mxu0 %v412_v13 }
 0x175   : > { %v1437_v18 = vpop.f32.mrb[0].mxu0 }
 0x176   : > { %v648_v20 = vmul.f32 %v1437_v18, %v2124_v17  ;;  %v496_v21 = vpop.f32.mrb[1].mxu0 }
 0x177   : > { %v647_v23 = vmul.f32 %v2124_v17, %v496_v21 }
 0x178   : > { %v664_v24 = vsub.f32 %v648_v20, %v614_v19 }
 0x179   : > { %v1440_v25 = vpop.f32.mrb[2].mxu0  ;;  %v663_v27 = vsub.f32 %v647_v23, %v613_v22 }
 0x17a   : > { %680 = vst [vmem:[%s2126_s25 + $0x8] sm:$0xff] %v664_v24  ;;  %v650_v28 = vmul.f32 %v1440_v25, %v2124_v17  ;;  %v506_v29 = vpop.f32.mrb[3].mxu0 }
 0x17b   : > { %v649_v31 = vmul.f32 %v2124_v17, %v506_v29  ;;  %679 = vst [vmem:[%s2126_s25] sm:$0xff] %v663_v27  ;;  %1491 = vmatprep.mubr.f32.mxu1 %v663_v27 }
 0x17c   : > { %v666_v32 = vsub.f32 %v650_v28, %v616_v26  ;;  %1492 = vmatmul.mubr.f32.vlgmr.msra.gmra.mrb[0].mxu1 %v664_v24 }
 0x17d   : > { %v665_v33 = vsub.f32 %v649_v31, %v615_v30  ;;  %v1443_v34 = vpop.f32.mrb[4].mxu0 }
 0x17e   : > { %682 = vst [vmem:[%s2126_s25 + $0x18] sm:$0xff] %v666_v32  ;;  %v652_v36 = vmul.f32 %v1443_v34, %v2124_v17  ;;  %v516_v37 = vpop.f32.mrb[5].mxu0  ;;  %v880_v34 = vld [vmem:[#allocation9] sm:$0xff] (!%p1298_p4) }
 0x17f   : > { %681 = vst [vmem:[%s2126_s25 + $0x10] sm:$0xff] %v665_v33  ;;  %v651_v39 = vmul.f32 %v2124_v17, %v516_v37  ;;  %1494 = vmatprep.mubr.f32.mxu1 %v665_v33 }
 0x180   : > { %v668_v40 = vsub.f32 %v652_v36, %v618_v35  ;;  %1495 = vmatmul.mubr.f32.gmra.mrb[2].mxu1 %v666_v32  ;;  %v881_v35 = vld [vmem:[#allocation9 + $0x8] sm:$0xff] (!%p1298_p4)  ;;  %v882_v36 = vld [vmem:[#allocation9 + $0x10] sm:$0xff] (!%p1298_p4) }
 0x181   : > { %v667_v41 = vsub.f32 %v651_v39, %v617_v38  ;;  %v1446_v42 = vpop.f32.mrb[6].mxu0  ;;  %v1635_v37 = vpack.c.bf16 (!%p1298_p4), %v881_v35, %v880_v34  ;;  %v883_v38 = vld [vmem:[#allocation9 + $0x18] sm:$0xff] (!%p1298_p4) }
 0x182   : > { %684 = vst [vmem:[%s2126_s25 + $0x28] sm:$0xff] %v668_v40  ;;  %v654_v44 = vmul.f32 %v1446_v42, %v2124_v17  ;;  %v526_v45 = vpop.f32.mrb[7].mxu0  ;;  %v1639_v39 = vpack.c.bf16 (!%p1298_p4), %v883_v38, %v882_v36 }
 0x183   : > { %683 = vst [vmem:[%s2126_s25 + $0x20] sm:$0xff] %v667_v41  ;;  %v653_v47 = vmul.f32 %v2124_v17, %v526_v45  ;;  %1497 = vmatprep.mubr.f32.mxu1 %v667_v41  ;;  %v885_v41 = vld [vmem:[#allocation9 + $0x28] sm:$0xff] (!%p1298_p4)  ;;  %1636 = vmatprep.subr.bf16.mxu0 (!%p1298_p4), %v1635_v37  ;;  %v886_v45 = vld [vmem:[#allocation9 + $0x30] sm:$0xff] (!%p1298_p4) }
 0x184   : > { %v670_v48 = vsub.f32 %v654_v44, %v620_v43  ;;  %1498 = vmatmul.mubr.f32.gmra.mrb[4].mxu1 %v668_v40  ;;  %v884_v40 = vld [vmem:[#allocation9 + $0x20] sm:$0xff] (!%p1298_p4)  ;;  %1667 = vmatprep.subr.bf16.mxu1 (!%p1298_p4), %v1635_v37 }
 0x185   : > { %v669_v49 = vsub.f32 %v653_v47, %v619_v46  ;;  %v1449_v50 = vpop.f32.mrb[8].mxu0  ;;  %1638 = vmatpush3.bf16.msra.mxu0 (!%p1298_p4), %v1635_v37  ;;  %1675 = vmatpush3.bf16.msra.mxu1 (!%p1298_p4), %v1635_v37  ;;  %v1643_v42 = vpack.c.bf16 (!%p1298_p4), %v885_v41, %v884_v40  ;;  %v887_v46 = vld [vmem:[#allocation9 + $0x38] sm:$0xff] (!%p1298_p4) }
 0x186   : > { %686 = vst [vmem:[%s2126_s25 + $0x38] sm:$0xff] %v670_v48  ;;  %v656_v52 = vmul.f32 %v1449_v50, %v2124_v17  ;;  %v536_v53 = vpop.f32.mrb[9].mxu0  ;;  %1640 = vmatprep.subr.bf16.mxu0 (!%p1298_p4), %v1639_v39  ;;  %1668 = vmatprep.subr.bf16.mxu1 (!%p1298_p4), %v1639_v39  ;;  %v1647_v47 = vpack.c.bf16 (!%p1298_p4), %v887_v46, %v886_v45 }
 0x187   : > { %685 = vst [vmem:[%s2126_s25 + $0x30] sm:$0xff] %v669_v49  ;;  %v655_v55 = vmul.f32 %v2124_v17, %v536_v53  ;;  %1500 = vmatprep.mubr.f32.mxu1 %v669_v49  ;;  %v889_v49 = vld [vmem:[#allocation9 + $0x48] sm:$0xff] (!%p1298_p4) }
 0x188   : > { %v672_v56 = vsub.f32 %v656_v52, %v622_v51  ;;  %1501 = vmatmul.mubr.f32.gmra.mrb[6].mxu1 %v670_v48  ;;  %v888_v48 = vld [vmem:[#allocation9 + $0x40] sm:$0xff] (!%p1298_p4)  ;;  %v890_v51 = vld [vmem:[#allocation9 + $0x50] sm:$0xff] (!%p1298_p4)  ;;  %v891_v52 = vld [vmem:[#allocation9 + $0x58] sm:$0xff] (!%p1298_p4) }
 0x189   : > { %v671_v57 = vsub.f32 %v655_v55, %v621_v54  ;;  %v1452_v58 = vpop.f32.mrb[10].mxu0  ;;  %1642 = vmatpush3.bf16.msra.mxu0 (!%p1298_p4), %v1639_v39  ;;  %1676 = vmatpush3.bf16.msra.mxu1 (!%p1298_p4), %v1639_v39  ;;  %v1651_v50 = vpack.c.bf16 (!%p1298_p4), %v889_v49, %v888_v48  ;;  %v1655_v53 = vpack.c.bf16 (!%p1298_p4), %v891_v52, %v890_v51  ;;  %v892_v54 = vld [vmem:[#allocation9 + $0x60] sm:$0xff] (!%p1298_p4)  ;;  %v893_v55 = vld [vmem:[#allocation9 + $0x68] sm:$0xff] (!%p1298_p4) }
 0x18a   : > { %688 = vst [vmem:[%s2126_s25 + $0x48] sm:$0xff] %v672_v56  ;;  %v658_v60 = vmul.f32 %v1452_v58, %v2124_v17  ;;  %v546_v61 = vpop.f32.mrb[11].mxu0  ;;  %1644 = vmatprep.subr.bf16.mxu0 (!%p1298_p4), %v1643_v42  ;;  %1669 = vmatprep.subr.bf16.mxu1 (!%p1298_p4), %v1643_v42  ;;  %v895_v58 = vld [vmem:[#allocation9 + $0x78] sm:$0xff] (!%p1298_p4) }
 0x18b   : > { %687 = vst [vmem:[%s2126_s25 + $0x40] sm:$0xff] %v671_v57  ;;  %v657_v63 = vmul.f32 %v2124_v17, %v546_v61  ;;  %1503 = vmatprep.mubr.f32.mxu1 %v671_v57  ;;  %v894_v57 = vld [vmem:[#allocation9 + $0x70] sm:$0xff] (!%p1298_p4) }
 0x18c   : > { %v674_v0 = vsub.f32 %v658_v60, %v624_v59  ;;  %1504 = vmatmul.mubr.f32.gmra.mrb[8].mxu1 %v672_v56  ;;  %v1659_v56 = vpack.c.bf16 (!%p1298_p4), %v893_v55, %v892_v54  ;;  %v1663_v59 = vpack.c.bf16 (!%p1298_p4), %v895_v58, %v894_v57 }
 0x18d   : > { %v673_v1 = vsub.f32 %v657_v63, %v623_v62  ;;  %v1455_v2 = vpop.f32.mrb[12].mxu0  ;;  %1646 = vmatpush3.bf16.msra.mxu0 (!%p1298_p4), %v1643_v42  ;;  %1677 = vmatpush3.bf16.msra.mxu1 (!%p1298_p4), %v1643_v42 }
 0x18e   : > { %690 = vst [vmem:[%s2126_s25 + $0x58] sm:$0xff] %v674_v0  ;;  %v660_v4 = vmul.f32 %v1455_v2, %v2124_v17  ;;  %v556_v5 = vpop.f32.mrb[13].mxu0  ;;  %1648 = vmatprep.subr.bf16.mxu0 (!%p1298_p4), %v1647_v47  ;;  %1670 = vmatprep.subr.bf16.mxu1 (!%p1298_p4), %v1647_v47 }
 0x18f   : > { %689 = vst [vmem:[%s2126_s25 + $0x50] sm:$0xff] %v673_v1  ;;  %v659_v7 = vmul.f32 %v2124_v17, %v556_v5  ;;  %1506 = vmatprep.mubr.f32.mxu1 %v673_v1 }
 0x190   : > { %v676_v8 = vsub.f32 %v660_v4, %v626_v3  ;;  %1507 = vmatmul.mubr.f32.gmra.mrb[10].mxu1 %v674_v0 }
 0x191   : > { %v675_v9 = vsub.f32 %v659_v7, %v625_v6  ;;  %v1458_v10 = vpop.f32.mrb[14].mxu0  ;;  %1650 = vmatpush3.bf16.msra.mxu0 (!%p1298_p4), %v1647_v47  ;;  %1678 = vmatpush3.bf16.msra.mxu1 (!%p1298_p4), %v1647_v47 }
 0x192   : > { %692 = vst [vmem:[%s2126_s25 + $0x68] sm:$0xff] %v676_v8  ;;  %v662_v12 = vmul.f32 %v1458_v10, %v2124_v17  ;;  %v566_v13 = vpop.f32.mrb[15].mxu0  ;;  %1652 = vmatprep.subr.bf16.mxu0 (!%p1298_p4), %v1651_v50  ;;  %1671 = vmatprep.subr.bf16.mxu1 (!%p1298_p4), %v1651_v50  ;;  %v1299_v10 = vld [vmem:[%s2280_s3] ss:$0 sm:$0xff] (!%p1298_p4) }
 0x193   : > { %691 = vst [vmem:[%s2126_s25 + $0x60] sm:$0xff] %v675_v9  ;;  %v661_v15 = vmul.f32 %v2124_v17, %v566_v13  ;;  %1509 = vmatprep.mubr.f32.mxu1 %v675_v9 }
 0x194   : > { %v678_v16 = vsub.f32 %v662_v12, %v628_v11  ;;  %1510 = vmatmul.mubr.f32.gmra.mrb[12].mxu1 %v676_v8 }
 0x195   : > { %v677_v18 = vsub.f32 %v661_v15, %v627_v14  ;;  %1654 = vmatpush3.bf16.msra.mxu0 (!%p1298_p4), %v1651_v50  ;;  %1679 = vmatpush3.bf16.msra.mxu1 (!%p1298_p4), %v1651_v50 }
 0x196   : > { %694 = vst [vmem:[%s2126_s25 + $0x78] sm:$0xff] %v678_v16  ;;  %1656 = vmatprep.subr.bf16.mxu0 (!%p1298_p4), %v1655_v53  ;;  %1672 = vmatprep.subr.bf16.mxu1 (!%p1298_p4), %v1655_v53 }
 0x197   : > { %693 = vst [vmem:[%s2126_s25 + $0x70] sm:$0xff] %v677_v18  ;;  %1512 = vmatprep.mubr.f32.mxu1 %v677_v18 }
 0x198   : > { %1513 = vmatmul.mubr.f32.gmra.mrb[14].mxu1 %v678_v16 }
 0x199   : > { %1658 = vmatpush3.bf16.msra.mxu0 (!%p1298_p4), %v1655_v53  ;;  %1680 = vmatpush3.bf16.msra.mxu1 (!%p1298_p4), %v1655_v53 }
 0x19a   : > { %1660 = vmatprep.subr.bf16.mxu0 (!%p1298_p4), %v1659_v56  ;;  %1673 = vmatprep.subr.bf16.mxu1 (!%p1298_p4), %v1659_v56 }
 0x19d   : > { %1662 = vmatpush3.bf16.msra.mxu0 (!%p1298_p4), %v1659_v56  ;;  %1681 = vmatpush3.bf16.msra.mxu1 (!%p1298_p4), %v1659_v56 }
 0x19e   : > { %v863_v43 = vld [vmem:[#allocation3] sm:$0xff] (!%p1298_p4)  ;;  %1664 = vmatprep.subr.bf16.mxu0 (!%p1298_p4), %v1663_v59  ;;  %1674 = vmatprep.subr.bf16.mxu1 (!%p1298_p4), %v1663_v59  ;;  %v864_v60 = vld [vmem:[#allocation3 + $0x8] sm:$0xff] (!%p1298_p4)  ;;  %v865_v62 = vld [vmem:[#allocation3 + $0x10] sm:$0xff] (!%p1298_p4) }
 0x19f   : > { %v871_v44 = vld [vmem:[#allocation3 + $0x40] sm:$0xff] (!%p1298_p4)  ;;  %1547 = vmatprep.mubr.f32.mxu0 (!%p1298_p4), %v863_v43  ;;  %v872_v61 = vld [vmem:[#allocation3 + $0x48] sm:$0xff] (!%p1298_p4)  ;;  %v873_v63 = vld [vmem:[#allocation3 + $0x50] sm:$0xff] (!%p1298_p4) }
 0x1a0   : > { %1559 = vmatprep.mubr.f32.mxu1 (!%p1298_p4), %v871_v44  ;;  %v866_v0 = vld [vmem:[#allocation3 + $0x18] sm:$0xff] (!%p1298_p4)  ;;  %v867_v2 = vld [vmem:[#allocation3 + $0x20] sm:$0xff] (!%p1298_p4)  ;;  %v868_v4 = vld [vmem:[#allocation3 + $0x28] sm:$0xff] (!%p1298_p4) }
 0x1a1   : > { %1666 = vmatpush3.bf16.msra.mxu0 (!%p1298_p4), %v1663_v59  ;;  %1682 = vmatpush3.bf16.msra.mxu1 (!%p1298_p4), %v1663_v59  ;;  %v874_v1 = vld [vmem:[#allocation3 + $0x58] sm:$0xff] (!%p1298_p4)  ;;  %v875_v3 = vld [vmem:[#allocation3 + $0x60] sm:$0xff] (!%p1298_p4)  ;;  %v876_v5 = vld [vmem:[#allocation3 + $0x68] sm:$0xff] (!%p1298_p4) }
 0x1a2   : > { %v869_v6 = vld [vmem:[#allocation3 + $0x30] sm:$0xff] (!%p1298_p4)  ;;  %v870_v8 = vld [vmem:[#allocation3 + $0x38] sm:$0xff] (!%p1298_p4) }
 0x1a3   : > { %v877_v7 = vld [vmem:[#allocation3 + $0x70] sm:$0xff] (!%p1298_p4)  ;;  %v878_v9 = vld [vmem:[#allocation3 + $0x78] sm:$0xff] (!%p1298_p4) }
 0x1a4   : > { %1548 = vmatmul.mubr.f32.vlgmr.msra.gmra.mrb[0].mxu0 (!%p1298_p4), %v864_v60 }
 0x1a5   : > { %1550 = vmatprep.mubr.f32.mxu0 (!%p1298_p4), %v865_v62 }
 0x1a8   : > { %1551 = vmatmul.mubr.f32.gmra.mrb[2].mxu0 (!%p1298_p4), %v866_v0 }
 0x1a9   : > { %1553 = vmatprep.mubr.f32.mxu0 (!%p1298_p4), %v867_v2 }
 0x1ac   : > { %1554 = vmatmul.mubr.f32.gmra.mrb[4].mxu0 (!%p1298_p4), %v868_v4 }
 0x1ad   : > { %1556 = vmatprep.mubr.f32.mxu0 (!%p1298_p4), %v869_v6 }
 0x1b0   : > { %1557 = vmatmul.mubr.f32.gmra.mrb[6].mxu0 (!%p1298_p4), %v870_v8 }
 0x24f   : > { %v2176_v19 = vpop.f32.mrb[0].mxu1 }
 0x250   : > { %v2178_v20 = vpop.f32.mrb[1].mxu1  ;;  %1560 = vmatmul.mubr.f32.vlgmr.msra.gmra.mrb[0].mxu1 (!%p1298_p4), %v872_v61 }
 0x251   : > { %1562 = vmatprep.mubr.f32.mxu1 (!%p1298_p4), %v873_v63 }
 0x253   : > { %v2180_v21 = vpop.f32.mrb[2].mxu1 }
 0x254   : > { %v2182_v22 = vpop.f32.mrb[3].mxu1  ;;  %1563 = vmatmul.mubr.f32.gmra.mrb[2].mxu1 (!%p1298_p4), %v874_v1 }
 0x255   : > { %1565 = vmatprep.mubr.f32.mxu1 (!%p1298_p4), %v875_v3 }
 0x257   : > { %v2184_v23 = vpop.f32.mrb[4].mxu1 }
 0x258   : > { %v2186_v24 = vpop.f32.mrb[5].mxu1  ;;  %1566 = vmatmul.mubr.f32.gmra.mrb[4].mxu1 (!%p1298_p4), %v876_v5 }
 0x259   : > { %1568 = vmatprep.mubr.f32.mxu1 (!%p1298_p4), %v877_v7 }
 0x25b   : > { %v2188_v17 = vpop.f32.mrb[6].mxu1 }
 0x25c   : > { %v2190_v25 = vpop.f32.mrb[7].mxu1  ;;  %1569 = vmatmul.mubr.f32.gmra.mrb[6].mxu1 (!%p1298_p4), %v878_v9 }
 0x25f   : > { %v2192_v26 = vpop.f32.mrb[8].mxu1 }
 0x260   : > { %v2194_v27 = vpop.f32.mrb[9].mxu1 }
 0x263   : > { %v2196_v28 = vpop.f32.mrb[10].mxu1 }
 0x264   : > { %v2198_v29 = vpop.f32.mrb[11].mxu1 }
 0x266   : > { %861 = sbr.rel (%p1298_p4) target bundleno = 822 (0x336), region = 68 }
 0x267   : > { %v2200_v30 = vpop.f32.mrb[12].mxu1 }
 0x268   : > { %v2202_v31 = vpop.f32.mrb[13].mxu1 }
 0x26b   : > { %v2204_v32 = vpop.f32.mrb[14].mxu1 }
 0x26c   : > { %v2206_v33 = vpop.f32.mrb[15].mxu1 }
 0x277   : > { %v1549_v11 = vpop.f32.mrb[0].mxu0 }
 0x278   : > { %v1048_v13 = vadd.f32 %v1549_v11, %v1299_v10  ;;  %v962_v15 = vpop.f32.mrb[1].mxu0 }
 0x279   : > { %v1047_v18 = vadd.f32 %v1299_v10, %v962_v15 }
 0x27a   : > { %v1064_v35 = vadd.f32 %v2176_v19, %v1048_v13 }
 0x27b   : > { %v1063_v37 = vadd.f32 %v1047_v18, %v2178_v20  ;;  %v1552_v39 = vpop.f32.mrb[2].mxu0 }
 0x27c   : > { %1081 = vst [vmem:[#allocation10 + $0x8] sm:$0xff] %v1064_v35  ;;  %v1050_v41 = vadd.f32 %v1552_v39, %v1299_v10  ;;  %v972_v43 = vpop.f32.mrb[3].mxu0 }
 0x27d   : > { %1080 = vst [vmem:[#allocation10] sm:$0xff] %v1063_v37  ;;  %v1049_v45 = vadd.f32 %v1299_v10, %v972_v43 }
 0x27e   : > { %v1066_v47 = vadd.f32 %v2180_v21, %v1050_v41 }
 0x27f   : > { %v1065_v49 = vadd.f32 %v1049_v45, %v2182_v22  ;;  %v1555_v51 = vpop.f32.mrb[4].mxu0 }
 0x280   : > { %1083 = vst [vmem:[#allocation10 + $0x18] sm:$0xff] %v1066_v47  ;;  %v1052_v53 = vadd.f32 %v1555_v51, %v1299_v10  ;;  %v982_v55 = vpop.f32.mrb[5].mxu0 }
 0x281   : > { %1082 = vst [vmem:[#allocation10 + $0x10] sm:$0xff] %v1065_v49  ;;  %v1051_v57 = vadd.f32 %v1299_v10, %v982_v55 }
 0x282   : > { %v1068_v59 = vadd.f32 %v2184_v23, %v1052_v53 }
 0x283   : > { %v1067_v61 = vadd.f32 %v1051_v57, %v2186_v24  ;;  %v1558_v63 = vpop.f32.mrb[6].mxu0 }
 0x284   : > { %1085 = vst [vmem:[#allocation10 + $0x28] sm:$0xff] %v1068_v59  ;;  %v1054_v1 = vadd.f32 %v1558_v63, %v1299_v10  ;;  %v992_v3 = vpop.f32.mrb[7].mxu0 }
 0x285   : > { %1084 = vst [vmem:[#allocation10 + $0x20] sm:$0xff] %v1067_v61  ;;  %v1053_v5 = vadd.f32 %v1299_v10, %v992_v3 }
 0x286   : > { %v1070_v7 = vadd.f32 %v2188_v17, %v1054_v1 }
 0x287   : > { %v1069_v9 = vadd.f32 %v1053_v5, %v2190_v25 }
 0x288   : > { %1087 = vst [vmem:[#allocation10 + $0x38] sm:$0xff] %v1070_v7 }
 0x289   : > { %1086 = vst [vmem:[#allocation10 + $0x30] sm:$0xff] %v1069_v9 }
 0x323   : > { %v1561_v12 = vpop.f32.mrb[0].mxu1 }
 0x324   : > { %v1056_v14 = vadd.f32 %v1561_v12, %v1299_v10  ;;  %v1002_v16 = vpop.f32.mrb[1].mxu1 }
 0x325   : > { %v1055_v34 = vadd.f32 %v1299_v10, %v1002_v16 }
 0x326   : > { %v1072_v36 = vadd.f32 %v2192_v26, %v1056_v14 }
 0x327   : > { %v1071_v38 = vadd.f32 %v1055_v34, %v2194_v27  ;;  %v1564_v40 = vpop.f32.mrb[2].mxu1 }
 0x328   : > { %1089 = vst [vmem:[#allocation10 + $0x48] sm:$0xff] %v1072_v36  ;;  %v1058_v42 = vadd.f32 %v1564_v40, %v1299_v10  ;;  %v1012_v44 = vpop.f32.mrb[3].mxu1 }
 0x329   : > { %1088 = vst [vmem:[#allocation10 + $0x40] sm:$0xff] %v1071_v38  ;;  %v1057_v46 = vadd.f32 %v1299_v10, %v1012_v44 }
 0x32a   : > { %v1074_v48 = vadd.f32 %v2196_v28, %v1058_v42 }
 0x32b   : > { %v1073_v50 = vadd.f32 %v1057_v46, %v2198_v29  ;;  %v1567_v52 = vpop.f32.mrb[4].mxu1 }
 0x32c   : > { %1091 = vst [vmem:[#allocation10 + $0x58] sm:$0xff] %v1074_v48  ;;  %v1060_v54 = vadd.f32 %v1567_v52, %v1299_v10  ;;  %v1022_v56 = vpop.f32.mrb[5].mxu1 }
 0x32d   : > { %1090 = vst [vmem:[#allocation10 + $0x50] sm:$0xff] %v1073_v50  ;;  %v1059_v58 = vadd.f32 %v1299_v10, %v1022_v56 }
 0x32e   : > { %v1076_v60 = vadd.f32 %v2200_v30, %v1060_v54 }
 0x32f   : > { %v1075_v62 = vadd.f32 %v1059_v58, %v2202_v31  ;;  %v1570_v0 = vpop.f32.mrb[6].mxu1 }
 0x330   : > { %1093 = vst [vmem:[#allocation10 + $0x68] sm:$0xff] %v1076_v60  ;;  %v1062_v2 = vadd.f32 %v1570_v0, %v1299_v10  ;;  %v1032_v4 = vpop.f32.mrb[7].mxu1 }
 0x331   : > { %1092 = vst [vmem:[#allocation10 + $0x60] sm:$0xff] %v1075_v62  ;;  %v1061_v6 = vadd.f32 %v1299_v10, %v1032_v4 }
 0x332   : > { %v1078_v8 = vadd.f32 %v2204_v32, %v1062_v2 }
 0x333   : > { %v1077_v11 = vadd.f32 %v1061_v6, %v2206_v33 }
 0x334   : > { %1095 = vst [vmem:[#allocation10 + $0x78] sm:$0xff] %v1078_v8 }
 0x335   : > { %1094 = vst [vmem:[#allocation10 + $0x70] sm:$0xff] %v1077_v11 }
 0x336 PF: > { %p1300_p7 = scmp.le.s32.totalorder %s1892_s15, 0 }
 0x337   : > { %v1101_v12 = vld [vmem:[#allocation10] sm:$0xff] (!%p1300_p7)  ;;  %v1102_v13 = vld [vmem:[#allocation10 + $0x8] sm:$0xff] (!%p1300_p7)  ;;  %v1103_v14 = vld [vmem:[#allocation10 + $0x10] sm:$0xff] (!%p1300_p7) }
 0x338   : > { %1099 = sbr.rel (%p1300_p7) target bundleno = 834 (0x342), region = 72  ;;  %v1117_v10 = vadd.f32 (!%p1300_p7), %v1101_v12, %v2178_v20  ;;  %v1118_v15 = vadd.f32 (!%p1300_p7), %v2176_v19, %v1102_v13  ;;  %v1119_v16 = vadd.f32 (!%p1300_p7), %v1103_v14, %v2182_v22  ;;  %v1104_v18 = vld [vmem:[#allocation10 + $0x18] sm:$0xff] (!%p1300_p7)  ;;  %v1105_v34 = vld [vmem:[#allocation10 + $0x20] sm:$0xff] (!%p1300_p7)  ;;  %v1106_v35 = vld [vmem:[#allocation10 + $0x28] sm:$0xff] (!%p1300_p7) }
 0x339   : > { %v1120_v36 = vadd.f32 (!%p1300_p7), %v2180_v21, %v1104_v18  ;;  %v1121_v37 = vadd.f32 (!%p1300_p7), %v1105_v34, %v2186_v24  ;;  %v1122_v38 = vadd.f32 (!%p1300_p7), %v2184_v23, %v1106_v35  ;;  %v1107_v39 = vld [vmem:[#allocation10 + $0x30] sm:$0xff] (!%p1300_p7)  ;;  %v1108_v40 = vld [vmem:[#allocation10 + $0x38] sm:$0xff] (!%p1300_p7)  ;;  %v1109_v41 = vld [vmem:[#allocation10 + $0x40] sm:$0xff] (!%p1300_p7) }
 0x33a   : > { %1133 = vst [vmem:[#allocation10] sm:$0xff] (!%p1300_p7), %v1117_v10  ;;  %1134 = vst [vmem:[#allocation10 + $0x8] sm:$0xff] (!%p1300_p7), %v1118_v15  ;;  %v1123_v20 = vadd.f32 (!%p1300_p7), %v1107_v39, %v2190_v25  ;;  %v1124_v19 = vadd.f32 (!%p1300_p7), %v2188_v17, %v1108_v40  ;;  %v1125_v22 = vadd.f32 (!%p1300_p7), %v1109_v41, %v2194_v27  ;;  %v1110_v42 = vld [vmem:[#allocation10 + $0x48] sm:$0xff] (!%p1300_p7)  ;;  %v1111_v43 = vld [vmem:[#allocation10 + $0x50] sm:$0xff] (!%p1300_p7) }
 0x33b   : > { %1135 = vst [vmem:[#allocation10 + $0x10] sm:$0xff] (!%p1300_p7), %v1119_v16  ;;  %v1112_v44 = vld [vmem:[#allocation10 + $0x58] sm:$0xff] (!%p1300_p7)  ;;  %1136 = vst [vmem:[#allocation10 + $0x18] sm:$0xff] (!%p1300_p7), %v1120_v36  ;;  %v1126_v21 = vadd.f32 (!%p1300_p7), %v2192_v26, %v1110_v42  ;;  %v1127_v23 = vadd.f32 (!%p1300_p7), %v1111_v43, %v2198_v29  ;;  %v1113_v45 = vld [vmem:[#allocation10 + $0x60] sm:$0xff] (!%p1300_p7) }
 0x33c   : > { %1137 = vst [vmem:[#allocation10 + $0x20] sm:$0xff] (!%p1300_p7), %v1121_v37  ;;  %1138 = vst [vmem:[#allocation10 + $0x28] sm:$0xff] (!%p1300_p7), %v1122_v38  ;;  %v1128_v24 = vadd.f32 (!%p1300_p7), %v2196_v28, %v1112_v44  ;;  %v1114_v46 = vld [vmem:[#allocation10 + $0x68] sm:$0xff] (!%p1300_p7)  ;;  %v1115_v47 = vld [vmem:[#allocation10 + $0x70] sm:$0xff] (!%p1300_p7)  ;;  %v1129_v17 = vadd.f32 (!%p1300_p7), %v1113_v45, %v2202_v31 }
 0x33d   : > { %1139 = vst [vmem:[#allocation10 + $0x30] sm:$0xff] (!%p1300_p7), %v1123_v20  ;;  %1140 = vst [vmem:[#allocation10 + $0x38] sm:$0xff] (!%p1300_p7), %v1124_v19  ;;  %v1130_v25 = vadd.f32 (!%p1300_p7), %v2200_v30, %v1114_v46  ;;  %v1131_v27 = vadd.f32 (!%p1300_p7), %v1115_v47, %v2206_v33  ;;  %v1116_v48 = vld [vmem:[#allocation10 + $0x78] sm:$0xff] (!%p1300_p7) }
 0x33e   : > { %1141 = vst [vmem:[#allocation10 + $0x40] sm:$0xff] (!%p1300_p7), %v1125_v22  ;;  %1142 = vst [vmem:[#allocation10 + $0x48] sm:$0xff] (!%p1300_p7), %v1126_v21  ;;  %v1132_v26 = vadd.f32 (!%p1300_p7), %v2204_v32, %v1116_v48 }
 0x33f   : > { %1143 = vst [vmem:[#allocation10 + $0x50] sm:$0xff] %v1127_v23  ;;  %1144 = vst [vmem:[#allocation10 + $0x58] sm:$0xff] %v1128_v24 }
 0x340   : > { %1145 = vst [vmem:[#allocation10 + $0x60] sm:$0xff] %v1129_v17  ;;  %1146 = vst [vmem:[#allocation10 + $0x68] sm:$0xff] %v1130_v25 }
 0x341   : > { %1147 = vst [vmem:[#allocation10 + $0x70] sm:$0xff] %v1131_v27  ;;  %1148 = vst [vmem:[#allocation10 + $0x78] sm:$0xff] %v1132_v26 }
 0x342 PF: > { %p1717_p8 = scmp.eq.s32.totalorder %s1952_s18, 1  ;;  %s1908_s15 = smov [#allocation10]  }
 0x343   : > { %s1155_s27 = sshll.u32 %s1908_s15, 4  ;;  %s1156_s27 = int_to_ptr.vmem [resolvable:$true] %s1155_s27 }
 0x344   : > { %s1836_s13 = scalar_lea.vmem %s1156_s27, 2048  ;;  %p1843_p3 = scmp.lt.s32.totalorder %s1156_s27, %s1156_s27 }
 0x345   : > { %p1837_p6 = scmp.ne.s32.totalorder %s1156_s27, %s1836_s13  ;;  %p1844_p10 = scmp.lt.s32.totalorder %s1836_s13, %s1836_s13 }
 0x347   : > { %p1838_p2 = pnand %p1837_p6, %p1717_p8  ;;  %p1845_p11 = por %p1844_p10, %p1843_p3 }
 0x349   : > { %p1839_p5 = pneg %p1838_p2 }
 0x34b   : > { %p1846_p9 = pnand %p1845_p11, %p1839_p5 }
 0x34d   : > { %1849 = shalt.err (!%p1846_p9)
}
 0x34e   : > { %s1850_s28 = scalar_lea.hbm %s2281_s4, 2048 }
 0x34f   : > { %p1851_p12 = scmp.ne.s32.totalorder %s2281_s4, %s1850_s28  ;;  %p1856_p1 = scmp.lt.u32.totalorder %s1850_s28, %s2281_s4 }
 0x351   : > { %p1852_p13 = pnand %p1851_p12, %p1717_p8 }
 0x353   : > { %p1853_p0 = pneg %p1852_p13 }
 0x355   : > { %p1858_p4 = pnand %p1856_p1, %p1853_p0 }
 0x357   : > { %1861 = shalt.err (!%p1858_p4)
}
 0x358   : > { %s1909_s30 = smov 128   ;;  %s1910_s5 = smov 8  }
 0x359   : > { %1696 = dma.vmem_to_hbm [thread:$0]  (%p1717_p8), %s1156_s27, 2048, %s2281_s4, [#allocation6], %s1909_s30, %s1909_s30, %s1910_s5  }
 0x35a   : > { %1887 = dma.done.wait (%p1717_p8), [#allocation6], 2048  }
 0x35b   : > { %1889 = vsyncadd (%p1717_p8), [#allocation6], 4294965248 }
 0x35c PF: > { %s19_s17 = sadd.s32 1, %s1900_s17   ;;  %s2298_s15 = smov %s1896_s16 }
 0x35d   : > { %p16_p7 = scmp.ge.s32.totalorder %s19_s17, 4   ;;  %s2299_s16 = smov %s2301_s23 }
 0x35f   :  { %18 = sbr.rel (!%p16_p7) target bundleno = 5 (0x5), region = 114 }
 0x366   :  { %1171 = vsyncpa [#allocation5], 1 }
 0x367   :  { %1173 = vsyncpa [#allocation5 + $0x1], 1 }
 0x368   :  { %1174 = vsyncpa [#allocation8], 1 }
 0x369   :  { %1176 = vsyncpa [#allocation8 + $0x1], 1 }
 0x36a   :  { %1177 = vsyncpa [#allocation6], 1 }
 0x36b   :  { %1179 = vsyncpa [#allocation6 + $0x1], 1 }

</bundles_post_ra>
